<compile_context>
chip_gen: v7x
topology: tpu7x:2x2x1
jax: 0.10.0
libtpu: 0.0.40
codegen_flags: <defaults>
</compile_context>

<pallas_src>
import functools

import jax
import jax.numpy as jnp
from jax import lax
from jax.experimental import pallas as pl
from jax.experimental.pallas import tpu as pltpu


def _round_up(x, m):
    return (x + m - 1) // m * m


def basic_block_kernel(x_ref, w1_ref, w2_ref, mask_ref, o_ref, *, W):
    # x_ref:    (1, C_pad, L)  one block; channels (padded to 8) on sublanes,
    #                          L = images_per_block * H*W on lanes (lane-dense)
    # w1_ref:   (C_pad, K)     conv1 weights, BN1 scale folded, + bias column
    # w2_ref:   (C_pad, K)     conv2 weights, BN2 scale folded, + bias column
    # mask_ref: (K, L)         1.0 where the tap stays inside its own image
    # o_ref:    (1, C_pad, L)
    L = x_ref.shape[2]
    x = x_ref[0]                                     # (C_pad, L)

    ones_tile = jnp.ones((8, L), jnp.float32)        # carries the BN bias row
    offsets = [dh * W + dw for dh in (-1, 0, 1) for dw in (-1, 0, 1)]

    def conv_bn(inp, w_ref):
        # im2col: 9 lane-shifted taps + ones tile -> (K, L); one masked
        # multiply; one MXU matmul. Wrapped lanes (image borders) are zeroed
        # by the precomputed mask, so jnp.roll's wraparound is harmless.
        parts = []
        for d in offsets:
            parts.append(inp if d == 0 else jnp.roll(inp, -d, axis=1))
        parts.append(ones_tile)
        stacked = jnp.concatenate(parts, axis=0) * mask_ref[...]
        return jnp.dot(w_ref[...], stacked, preferred_element_type=jnp.float32)

    out1 = jnp.maximum(conv_bn(x, w1_ref), 0.0)      # conv1 + bn1 + relu
    out2 = conv_bn(out1, w2_ref)                     # conv2 + bn2
    # residual add (stride==1, Cin==Cout -> identity skip) + relu
    o_ref[0] = jnp.maximum(out2 + x, 0.0).astype(o_ref.dtype)


def basic_block(x_nchw, w1_oihw, w2_oihw, bn1, bn2, eps=1e-5):
    """Fused BasicBlock forward. x_nchw: (N, C, H, W) float32 (PyTorch layout)."""
    N, Cin, H, W = x_nchw.shape
    Cout = w1_oihw.shape[0]
    assert Cin == Cout, "this instantiation uses the pure-skip identity path"
    HW = H * W
    C_pad = _round_up(max(Cin, Cout), 8)             # sublane-aligned channels
    K = 9 * C_pad + 8                                # 9 taps + bias tile

    # At most 2 grid blocks: keeps both v7x TensorCores busy when N is even,
    # while v5e/v6e (single TC) pay at most 2 grid-step overheads; all images
    # of a block share the lane axis.
    num_blocks = 2 if (N >= 2 and N % 2 == 0) else 1
    ipb = N // num_blocks                            # images per block
    L = ipb * HW                                     # lane width per block

    # ---- fold BN (inference) into weights + bias column (trace time) --------
    def fold(w_oihw, bn):
        g, b, m, v = bn
        s = g / jnp.sqrt(v + eps)
        bias = b - m * s
        w = w_oihw * s[:, None, None, None]          # (O, I, 3, 3), scale folded
        w = jnp.transpose(w, (0, 2, 3, 1))           # (O, kh, kw, I) tap-major
        w = jnp.pad(w, ((0, 0), (0, 0), (0, 0), (0, C_pad - w.shape[-1])))
        w = w.reshape(Cout, 9 * C_pad)
        bias_cols = jnp.zeros((Cout, 8), w.dtype).at[:, 0].set(bias)
        w = jnp.concatenate([w, bias_cols], axis=1)  # (Cout, K)
        return jnp.pad(w, ((0, C_pad - Cout), (0, 0)))  # (C_pad, K)

    w1f = fold(w1_oihw, bn1)
    w2f = fold(w2_oihw, bn2)

    # ---- halo mask: image-local row/col tests, computed once in the wrapper --
    q = jnp.arange(L)
    p = q % HW                                       # image-local flat position
    row, col = p // W, p % W
    row_ok = {-1: row >= 1, 0: jnp.ones((L,), bool), 1: row <= H - 2}
    col_ok = {-1: col >= 1, 0: jnp.ones((L,), bool), 1: col <= W - 2}
    tap_masks = []
    for dh in (-1, 0, 1):
        for dw in (-1, 0, 1):
            m = (row_ok[dh] & col_ok[dw]).astype(jnp.float32)
            tap_masks.append(jnp.broadcast_to(m, (C_pad, L)))
    tap_masks.append(jnp.ones((8, L), jnp.float32))  # bias tile stays ones
    mask = jnp.concatenate(tap_masks, axis=0)        # (K, L)

    # ---- input: NCHW -> (num_blocks, C_pad, L) ------------------------------
    x_flat = x_nchw.reshape(N, Cin, HW)
    x_flat = jnp.pad(x_flat, ((0, 0), (0, C_pad - Cin), (0, 0)))
    x_blk = (x_flat.reshape(num_blocks, ipb, C_pad, HW)
             .transpose(0, 2, 1, 3).reshape(num_blocks, C_pad, L))

    kernel = functools.partial(basic_block_kernel, W=W)

    flops = 2 * 2 * N * HW * K * C_pad               # two im2col matmuls
    bytes_accessed = 4 * (x_blk.size + w1f.size + w2f.size + mask.size
                          + num_blocks * C_pad * L)

    out_blk = pl.pallas_call(
        kernel,
        out_shape=jax.ShapeDtypeStruct((num_blocks, C_pad, L), x_nchw.dtype),
        grid_spec=pltpu.PrefetchScalarGridSpec(
            num_scalar_prefetch=0,
            grid=(num_blocks,),
            in_specs=[
                pl.BlockSpec((1, C_pad, L), lambda g: (g, 0, 0)),
                pl.BlockSpec((C_pad, K), lambda g: (0, 0)),
                pl.BlockSpec((C_pad, K), lambda g: (0, 0)),
                pl.BlockSpec((K, L), lambda g: (0, 0)),
            ],
            out_specs=pl.BlockSpec((1, C_pad, L), lambda g: (g, 0, 0)),
        ),
        compiler_params=pltpu.CompilerParams(
            dimension_semantics=("parallel",)),
        cost_estimate=pl.CostEstimate(
            flops=flops, transcendentals=0, bytes_accessed=bytes_accessed),
    )(x_blk, w1f, w2f, mask)

    out = (out_blk.reshape(num_blocks, C_pad, ipb, HW)
           .transpose(0, 2, 1, 3).reshape(N, C_pad, HW)[:, :Cout])
    return out.reshape(N, Cout, H, W)                # back to NCHW


def ref_basic_block(x, w1, w2, bn1, bn2, eps=1e-5):
    """Pure-JAX reference (matches PyTorch eval-mode semantics)."""
    def conv(a, w):
        return lax.conv_general_dilated(
            a, w, window_strides=(1, 1), padding=((1, 1), (1, 1)),
            dimension_numbers=("NCHW", "OIHW", "NCHW"))

    def bn(a, p):
        g, b, m, v = p
        inv = g / jnp.sqrt(v + eps)
        return a * inv[None, :, None, None] + (b - m * inv)[None, :, None, None]

    out = jax.nn.relu(bn(conv(x, w1), bn1))
    out = bn(conv(out, w2), bn2)
    return jax.nn.relu(out + x)


if __name__ == "__main__":
    N, C, H, W = 2, 4, 16, 16  # stride=1, in_channels == out_channels == 4
    keys = jax.random.split(jax.random.PRNGKey(0), 12)

    x = jax.random.normal(keys[0], (N, C, H, W), jnp.float32)
    w1 = jax.random.normal(keys[1], (C, C, 3, 3), jnp.float32) * 0.2
    w2 = jax.random.normal(keys[2], (C, C, 3, 3), jnp.float32) * 0.2

    bn1 = (1.0 + 0.1 * jax.random.normal(keys[3], (C,), jnp.float32),   # gamma
           0.1 * jax.random.normal(keys[4], (C,), jnp.float32),          # beta
           0.1 * jax.random.normal(keys[5], (C,), jnp.float32),          # running_mean
           0.9 + 0.1 * jnp.abs(jax.random.normal(keys[6], (C,), jnp.float32)))  # running_var
    bn2 = (1.0 + 0.1 * jax.random.normal(keys[7], (C,), jnp.float32),
           0.1 * jax.random.normal(keys[8], (C,), jnp.float32),
           0.1 * jax.random.normal(keys[9], (C,), jnp.float32),
           0.9 + 0.1 * jnp.abs(jax.random.normal(keys[10], (C,), jnp.float32)))

    out = jax.block_until_ready(basic_block(x, w1, w2, bn1, bn2))
    ref = jax.block_until_ready(ref_basic_block(x, w1, w2, bn1, bn2))

    assert out.shape == (N, C, H, W)
    assert jnp.allclose(out, ref, atol=1e-4, rtol=1e-4), (
        f"max abs err = {jnp.max(jnp.abs(out - ref))}")
    print("KERNEL_OK")
</pallas_src>

<mosaic_0001>
module attributes {stable_mosaic.version = 11 : i64} {
  func.func @basic_block_kernel(%arg0: i32, %arg1: memref<1x8x256xf32, #tpu.memory_space<vmem>>, %arg2: memref<8x80xf32, #tpu.memory_space<vmem>>, %arg3: memref<8x80xf32, #tpu.memory_space<vmem>>, %arg4: memref<80x256xf32, #tpu.memory_space<vmem>>, %arg5: memref<1x8x256xf32, #tpu.memory_space<vmem>>) attributes {dimension_semantics = [#tpu.dimension_semantics<parallel>], iteration_bounds = array<i64: 2>, scalar_prefetch = 0 : i64, scratch_operands = 0 : i64, tpu.core_type = #tpu.core_type<tc>, window_params = [{transform_indices = @transform_0, window_bounds = array<i64: 1, 8, 256>}, {pipeline_mode = #tpu.pipeline_mode<synchronous>, transform_indices = @transform_1, window_bounds = array<i64: 8, 80>}, {pipeline_mode = #tpu.pipeline_mode<synchronous>, transform_indices = @transform_2, window_bounds = array<i64: 8, 80>}, {pipeline_mode = #tpu.pipeline_mode<synchronous>, transform_indices = @transform_3, window_bounds = array<i64: 80, 256>}, {transform_indices = @transform_4, window_bounds = array<i64: 1, 8, 256>}]} {
    %c0 = arith.constant 0 : index
    %c0_0 = arith.constant 0 : index
    %c0_1 = arith.constant 0 : index
    %0 = vector.load %arg1[%c0, %c0_0, %c0_1] : memref<1x8x256xf32, #tpu.memory_space<vmem>>, vector<1x8x256xf32>
    %1 = vector.shape_cast %0 : vector<1x8x256xf32> to vector<8x256xf32>
    %cst = arith.constant 1.000000e+00 : f32
    %2 = vector.broadcast %cst : f32 to vector<8x256xf32>
    %3 = vector.extract_strided_slice %1 {offsets = [0, 239], sizes = [8, 17], strides = [1, 1]} : vector<8x256xf32> to vector<8x17xf32>
    %4 = vector.extract_strided_slice %1 {offsets = [0, 0], sizes = [8, 239], strides = [1, 1]} : vector<8x256xf32> to vector<8x239xf32>
    %5 = tpu.concatenate %3, %4 in 1 : vector<8x17xf32>, vector<8x239xf32> -> vector<8x256xf32>
    %6 = vector.extract_strided_slice %1 {offsets = [0, 240], sizes = [8, 16], strides = [1, 1]} : vector<8x256xf32> to vector<8x16xf32>
    %7 = vector.extract_strided_slice %1 {offsets = [0, 0], sizes = [8, 240], strides = [1, 1]} : vector<8x256xf32> to vector<8x240xf32>
    %8 = tpu.concatenate %6, %7 in 1 : vector<8x16xf32>, vector<8x240xf32> -> vector<8x256xf32>
    %9 = vector.extract_strided_slice %1 {offsets = [0, 241], sizes = [8, 15], strides = [1, 1]} : vector<8x256xf32> to vector<8x15xf32>
    %10 = vector.extract_strided_slice %1 {offsets = [0, 0], sizes = [8, 241], strides = [1, 1]} : vector<8x256xf32> to vector<8x241xf32>
    %11 = tpu.concatenate %9, %10 in 1 : vector<8x15xf32>, vector<8x241xf32> -> vector<8x256xf32>
    %12 = vector.extract_strided_slice %1 {offsets = [0, 255], sizes = [8, 1], strides = [1, 1]} : vector<8x256xf32> to vector<8x1xf32>
    %13 = vector.extract_strided_slice %1 {offsets = [0, 0], sizes = [8, 255], strides = [1, 1]} : vector<8x256xf32> to vector<8x255xf32>
    %14 = tpu.concatenate %12, %13 in 1 : vector<8x1xf32>, vector<8x255xf32> -> vector<8x256xf32>
    %15 = vector.extract_strided_slice %1 {offsets = [0, 1], sizes = [8, 255], strides = [1, 1]} : vector<8x256xf32> to vector<8x255xf32>
    %16 = vector.extract_strided_slice %1 {offsets = [0, 0], sizes = [8, 1], strides = [1, 1]} : vector<8x256xf32> to vector<8x1xf32>
    %17 = tpu.concatenate %15, %16 in 1 : vector<8x255xf32>, vector<8x1xf32> -> vector<8x256xf32>
    %18 = vector.extract_strided_slice %1 {offsets = [0, 15], sizes = [8, 241], strides = [1, 1]} : vector<8x256xf32> to vector<8x241xf32>
    %19 = vector.extract_strided_slice %1 {offsets = [0, 0], sizes = [8, 15], strides = [1, 1]} : vector<8x256xf32> to vector<8x15xf32>
    %20 = tpu.concatenate %18, %19 in 1 : vector<8x241xf32>, vector<8x15xf32> -> vector<8x256xf32>
    %21 = vector.extract_strided_slice %1 {offsets = [0, 16], sizes = [8, 240], strides = [1, 1]} : vector<8x256xf32> to vector<8x240xf32>
    %22 = vector.extract_strided_slice %1 {offsets = [0, 0], sizes = [8, 16], strides = [1, 1]} : vector<8x256xf32> to vector<8x16xf32>
    %23 = tpu.concatenate %21, %22 in 1 : vector<8x240xf32>, vector<8x16xf32> -> vector<8x256xf32>
    %24 = vector.extract_strided_slice %1 {offsets = [0, 17], sizes = [8, 239], strides = [1, 1]} : vector<8x256xf32> to vector<8x239xf32>
    %25 = vector.extract_strided_slice %1 {offsets = [0, 0], sizes = [8, 17], strides = [1, 1]} : vector<8x256xf32> to vector<8x17xf32>
    %26 = tpu.concatenate %24, %25 in 1 : vector<8x239xf32>, vector<8x17xf32> -> vector<8x256xf32>
    %27 = tpu.concatenate %5, %8, %11, %14, %1, %17, %20, %23, %26, %2 in 0 : vector<8x256xf32>, vector<8x256xf32>, vector<8x256xf32>, vector<8x256xf32>, vector<8x256xf32>, vector<8x256xf32>, vector<8x256xf32>, vector<8x256xf32>, vector<8x256xf32>, vector<8x256xf32> -> vector<80x256xf32>
    %c0_2 = arith.constant 0 : index
    %c0_3 = arith.constant 0 : index
    %28 = vector.load %arg4[%c0_2, %c0_3] : memref<80x256xf32, #tpu.memory_space<vmem>>, vector<80x256xf32>
    %29 = arith.mulf %27, %28 : vector<80x256xf32>
    %c0_4 = arith.constant 0 : index
    %c0_5 = arith.constant 0 : index
    %30 = vector.load %arg2[%c0_4, %c0_5] : memref<8x80xf32, #tpu.memory_space<vmem>>, vector<8x80xf32>
    %cst_6 = arith.constant dense<0.000000e+00> : vector<8x256xf32>
    %31 = tpu.matmul %30, %29, %cst_6 {dimension_numbers = #tpu.dot_dimension_numbers<[1], [0], [0], [1], [0, 0, 1, 1], [], []>} : vector<8x80xf32>, vector<80x256xf32>, vector<8x256xf32> -> vector<8x256xf32>
    %cst_7 = arith.constant 0.000000e+00 : f32
    %32 = vector.broadcast %cst_7 : f32 to vector<8x256xf32>
    %33 = arith.maximumf %31, %32 : vector<8x256xf32>
    %34 = vector.extract_strided_slice %33 {offsets = [0, 239], sizes = [8, 17], strides = [1, 1]} : vector<8x256xf32> to vector<8x17xf32>
    %35 = vector.extract_strided_slice %33 {offsets = [0, 0], sizes = [8, 239], strides = [1, 1]} : vector<8x256xf32> to vector<8x239xf32>
    %36 = tpu.concatenate %34, %35 in 1 : vector<8x17xf32>, vector<8x239xf32> -> vector<8x256xf32>
    %37 = vector.extract_strided_slice %33 {offsets = [0, 240], sizes = [8, 16], strides = [1, 1]} : vector<8x256xf32> to vector<8x16xf32>
    %38 = vector.extract_strided_slice %33 {offsets = [0, 0], sizes = [8, 240], strides = [1, 1]} : vector<8x256xf32> to vector<8x240xf32>
    %39 = tpu.concatenate %37, %38 in 1 : vector<8x16xf32>, vector<8x240xf32> -> vector<8x256xf32>
    %40 = vector.extract_strided_slice %33 {offsets = [0, 241], sizes = [8, 15], strides = [1, 1]} : vector<8x256xf32> to vector<8x15xf32>
    %41 = vector.extract_strided_slice %33 {offsets = [0, 0], sizes = [8, 241], strides = [1, 1]} : vector<8x256xf32> to vector<8x241xf32>
    %42 = tpu.concatenate %40, %41 in 1 : vector<8x15xf32>, vector<8x241xf32> -> vector<8x256xf32>
    %43 = vector.extract_strided_slice %33 {offsets = [0, 255], sizes = [8, 1], strides = [1, 1]} : vector<8x256xf32> to vector<8x1xf32>
    %44 = vector.extract_strided_slice %33 {offsets = [0, 0], sizes = [8, 255], strides = [1, 1]} : vector<8x256xf32> to vector<8x255xf32>
    %45 = tpu.concatenate %43, %44 in 1 : vector<8x1xf32>, vector<8x255xf32> -> vector<8x256xf32>
    %46 = vector.extract_strided_slice %33 {offsets = [0, 1], sizes = [8, 255], strides = [1, 1]} : vector<8x256xf32> to vector<8x255xf32>
    %47 = vector.extract_strided_slice %33 {offsets = [0, 0], sizes = [8, 1], strides = [1, 1]} : vector<8x256xf32> to vector<8x1xf32>
    %48 = tpu.concatenate %46, %47 in 1 : vector<8x255xf32>, vector<8x1xf32> -> vector<8x256xf32>
    %49 = vector.extract_strided_slice %33 {offsets = [0, 15], sizes = [8, 241], strides = [1, 1]} : vector<8x256xf32> to vector<8x241xf32>
    %50 = vector.extract_strided_slice %33 {offsets = [0, 0], sizes = [8, 15], strides = [1, 1]} : vector<8x256xf32> to vector<8x15xf32>
    %51 = tpu.concatenate %49, %50 in 1 : vector<8x241xf32>, vector<8x15xf32> -> vector<8x256xf32>
    %52 = vector.extract_strided_slice %33 {offsets = [0, 16], sizes = [8, 240], strides = [1, 1]} : vector<8x256xf32> to vector<8x240xf32>
    %53 = vector.extract_strided_slice %33 {offsets = [0, 0], sizes = [8, 16], strides = [1, 1]} : vector<8x256xf32> to vector<8x16xf32>
    %54 = tpu.concatenate %52, %53 in 1 : vector<8x240xf32>, vector<8x16xf32> -> vector<8x256xf32>
    %55 = vector.extract_strided_slice %33 {offsets = [0, 17], sizes = [8, 239], strides = [1, 1]} : vector<8x256xf32> to vector<8x239xf32>
    %56 = vector.extract_strided_slice %33 {offsets = [0, 0], sizes = [8, 17], strides = [1, 1]} : vector<8x256xf32> to vector<8x17xf32>
    %57 = tpu.concatenate %55, %56 in 1 : vector<8x239xf32>, vector<8x17xf32> -> vector<8x256xf32>
    %58 = tpu.concatenate %36, %39, %42, %45, %33, %48, %51, %54, %57, %2 in 0 : vector<8x256xf32>, vector<8x256xf32>, vector<8x256xf32>, vector<8x256xf32>, vector<8x256xf32>, vector<8x256xf32>, vector<8x256xf32>, vector<8x256xf32>, vector<8x256xf32>, vector<8x256xf32> -> vector<80x256xf32>
    %c0_8 = arith.constant 0 : index
    %c0_9 = arith.constant 0 : index
    %59 = vector.load %arg4[%c0_8, %c0_9] : memref<80x256xf32, #tpu.memory_space<vmem>>, vector<80x256xf32>
    %60 = arith.mulf %58, %59 : vector<80x256xf32>
    %c0_10 = arith.constant 0 : index
    %c0_11 = arith.constant 0 : index
    %61 = vector.load %arg3[%c0_10, %c0_11] : memref<8x80xf32, #tpu.memory_space<vmem>>, vector<8x80xf32>
    %cst_12 = arith.constant dense<0.000000e+00> : vector<8x256xf32>
    %62 = tpu.matmul %61, %60, %cst_12 {dimension_numbers = #tpu.dot_dimension_numbers<[1], [0], [0], [1], [0, 0, 1, 1], [], []>} : vector<8x80xf32>, vector<80x256xf32>, vector<8x256xf32> -> vector<8x256xf32>
    %63 = arith.addf %62, %1 : vector<8x256xf32>
    %cst_13 = arith.constant 0.000000e+00 : f32
    %64 = vector.broadcast %cst_13 : f32 to vector<8x256xf32>
    %65 = arith.maximumf %63, %64 : vector<8x256xf32>
    %c0_14 = arith.constant 0 : index
    %c0_15 = arith.constant 0 : index
    %c0_16 = arith.constant 0 : index
    %66 = vector.load %arg5[%c0_14, %c0_15, %c0_16] : memref<1x8x256xf32, #tpu.memory_space<vmem>>, vector<1x8x256xf32>
    %67 = vector.shape_cast %66 : vector<1x8x256xf32> to vector<8x256xf32>
    %68 = vector.shape_cast %65 : vector<8x256xf32> to vector<1x8x256xf32>
    tpu.vector_store %arg5[%c0_14, %c0_15, %c0_16], %68 {strides = array<i32>} : memref<1x8x256xf32, #tpu.memory_space<vmem>>, vector<1x8x256xf32>,
    return
  }
  func.func @transform_0(%arg0: i32) -> (i32, i32, i32) {
    %c0_i32 = arith.constant 0 : i32
    %c0_i32_0 = arith.constant 0 : i32
    %c0_i32_1 = arith.constant 0 : i32
    return %arg0, %c0_i32, %c0_i32_0 : i32, i32, i32
  }
  func.func @transform_1(%arg0: i32) -> (i32, i32) {
    %c0_i32 = arith.constant 0 : i32
    %c0_i32_0 = arith.constant 0 : i32
    %c0_i32_1 = arith.constant 0 : i32
    return %c0_i32, %c0_i32_0 : i32, i32
  }
  func.func @transform_2(%arg0: i32) -> (i32, i32) {
    %c0_i32 = arith.constant 0 : i32
    %c0_i32_0 = arith.constant 0 : i32
    %c0_i32_1 = arith.constant 0 : i32
    return %c0_i32, %c0_i32_0 : i32, i32
  }
  func.func @transform_3(%arg0: i32) -> (i32, i32) {
    %c0_i32 = arith.constant 0 : i32
    %c0_i32_0 = arith.constant 0 : i32
    %c0_i32_1 = arith.constant 0 : i32
    return %c0_i32, %c0_i32_0 : i32, i32
  }
  func.func @transform_4(%arg0: i32) -> (i32, i32, i32) {
    %c0_i32 = arith.constant 0 : i32
    %c0_i32_0 = arith.constant 0 : i32
    %c0_i32_1 = arith.constant 0 : i32
    return %arg0, %c0_i32, %c0_i32_0 : i32, i32, i32
  }
}

</mosaic_0001>

<bundles_post_ra>
// kernel: tpu_custom_call.1
= control target key start
LH: loop header
LB: loop body
LE: loop exit
PB: predicated region body
PF: predicated region fallthrough
CT: control target
= control target key end

     0   :  { %9 = vsyncpa [#allocation3], 0  ;;  %s1558_s0 = inlined_call_operand.hbm [shape: f32[2,8,256], index: 0, kind: input, shape index: {}]   ;;  %s1559_s1 = inlined_call_operand.hbm [shape: f32[8,80], index: 1, kind: input, shape index: {}]   ;;  %s1560_s2 = inlined_call_operand.hbm [shape: f32[8,80], index: 2, kind: input, shape index: {}]   ;;  %s1561_s3 = inlined_call_operand.hbm [shape: f32[80,256], index: 3, kind: input, shape index: {}]   ;;  %s1562_s4 = inlined_call_operand.hbm [shape: f32[2,8,256], index: 4, kind: output, shape index: {}]  }
   0x1   :  { %11 = vsyncpa [#allocation3 + $0x1], 0 }
   0x2   :  { %12 = vsyncpa [#allocation6], 0 }
   0x3   :  { %13 = vsyncpa [#allocation9], 0 }
   0x4   :  { %14 = vsyncpa [#allocation4], 0 }
   0x5   :  { %16 = vsyncpa [#allocation4 + $0x1], 0  ;;  %s1122_s15 = smov 0   ;;  %s1124_s16 = smov 0  }
   0x6   :  { %s1126_s17 = smov 0   ;;  %s1128_s18 = smov 0  }
   0x7 LB: > { %s1143_s19 = sadd.s32 4294967295, %s1079_s18   ;;  %s739_s20 = sadd.s32 4294967294, %s1079_s18   ;;  %s1079_s18 = sphi %s1128_s18, %s1585_s18   ;;  %s1075_s17 = sphi %s1126_s17, %s1584_s17   ;;  %s1071_s16 = sphi %s1124_s16, %s1583_s16   ;;  %s1067_s15 = sphi %s1122_s15, %s1582_s15  }
   0x8   : > { %p42_p0 = scmp.ne.s32.totalorder %s1071_s16, %s1067_s15  ;;  %p1563_p1 = scmp.eq.s32.totalorder %s1143_s19, 0 }
   0x9   : > { %p135_p3 = scmp.eq.s32.totalorder %s739_s20, 1  ;;  %p740_p5 = scmp.ge.s32.totalorder %s1079_s18, 1 }
   0xa   : > { %p1152_p4 = por %p1563_p1, %p42_p0  ;;  %p142_p7 = scmp.lt.s32.totalorder %s1079_s18, 3 }
   0xb   : > { %p1157_p6 = por %p135_p3, %p42_p0  ;;  %s1081_s24 = smov [#allocation5]  }
   0xc   : > { %s1566_s21 = scalar_select %p1152_p4, 1, 0 }
   0xd   : > { %s1567_s22 = scalar_select %p1157_p6, 1, 0 }
   0xe   : > { %p1162_p8 = pnand %p740_p5, %p142_p7  ;;  %s155_s25 = sshll.u32 %s1081_s24, 4  ;;  %s156_s25 = int_to_ptr.vmem [resolvable:$true] %s155_s25 }
   0xf   : > { %s1082_s26 = smov [#allocation7]   ;;  %s1083_s29 = smov [#allocation8]  }
  0x10   : > { %s1568_s23 = scalar_select %p1162_p8, 1, 0 }
  0x11   : > { %p819_p10 = pneg %p1162_p8  ;;  %s166_s27 = sshll.u32 %s1082_s26, 4  ;;  %s1175_s27 = int_to_ptr.vmem [resolvable:$true] %s166_s27 }
  0x12   : > { %s176_s30 = sshll.u32 %s1083_s29, 4  ;;  %s891_s7 = scalar_lea.hbm %s1559_s1, 128  ;;  %s1177_s30 = int_to_ptr.vmem [resolvable:$true] %s176_s30 }
  0x13   : > { %p1171_p11 = pnand %p819_p10, %p1563_p1  ;;  %p892_p12 = scmp.ne.s32.totalorder %s1559_s1, %s891_s7 }
  0x14   : > { %p898_p5 = scmp.lt.u32.totalorder %s891_s7, %s1559_s1 }
  0x15   : > { %p1187_p13 = pneg %p1171_p11 }
  0x17   : > { %p894_p0 = pnand %p1187_p13, %p892_p12 }
  0x19   : > { %p895_p3 = pneg %p894_p0 }
  0x1b   : > { %p900_p7 = pnand %p898_p5, %p895_p3 }
  0x1d   : > { %903 = shalt.err (!%p900_p7)
}
  0x1e   : > { %s904_s13 = scalar_lea.vmem %s156_s25, 128  ;;  %p912_p2 = scmp.lt.s32.totalorder %s156_s25, %s156_s25 }
  0x1f   : > { %p905_p10 = scmp.ne.s32.totalorder %s156_s25, %s904_s13  ;;  %p913_p6 = scmp.lt.s32.totalorder %s904_s13, %s904_s13 }
  0x21   : > { %p907_p9 = pnand %p905_p10, %p1187_p13  ;;  %p914_p4 = por %p913_p6, %p912_p2 }
  0x23   : > { %p908_p1 = pneg %p907_p9 }
  0x25   : > { %p915_p8 = pnand %p914_p4, %p908_p1 }
  0x27   : > { %918 = shalt.err (!%p915_p8)
}
  0x28   : > { %822 = dma.hbm_to_vmem [thread:$0]  (!%p1171_p11), %s1559_s1, 128, %s156_s25, [#allocation6]  }
  0x29   : > { %s919_s29 = scalar_lea.hbm %s1560_s2, 128 }
  0x2a   : > { %p920_p9 = scmp.ne.s32.totalorder %s1560_s2, %s919_s29  ;;  %p926_p1 = scmp.lt.u32.totalorder %s919_s29, %s1560_s2 }
  0x2c   : > { %p922_p12 = pnand %p920_p9, %p1187_p13 }
  0x2e   : > { %p923_p2 = pneg %p922_p12 }
  0x30   : > { %p928_p4 = pnand %p926_p1, %p923_p2 }
  0x32   : > { %931 = shalt.err (!%p928_p4)
}
  0x33   : > { %s932_s25 = scalar_lea.vmem %s1175_s27, 128  ;;  %p940_p3 = scmp.lt.s32.totalorder %s1175_s27, %s1175_s27 }
  0x34   : > { %p933_p6 = scmp.ne.s32.totalorder %s1175_s27, %s932_s25  ;;  %p941_p5 = scmp.lt.s32.totalorder %s932_s25, %s932_s25 }
  0x36   : > { %p935_p8 = pnand %p933_p6, %p1187_p13  ;;  %p942_p7 = por %p941_p5, %p940_p3 }
  0x38   : > { %p936_p0 = pneg %p935_p8 }
  0x3a   : > { %p943_p10 = pnand %p942_p7, %p936_p0 }
  0x3c   : > { %946 = shalt.err (!%p943_p10)
}
  0x3d   : > { %825 = dma.hbm_to_vmem [thread:$0]  (!%p1171_p11), %s1560_s2, 128, %s1175_s27, [#allocation6]  }
  0x3e   : > { %s947_s14 = scalar_lea.hbm %s1561_s3, 2560 }
  0x3f   : > { %p948_p9 = scmp.ne.s32.totalorder %s1561_s3, %s947_s14  ;;  %p954_p1 = scmp.lt.u32.totalorder %s947_s14, %s1561_s3 }
  0x41   : > { %p950_p12 = pnand %p948_p9, %p1187_p13 }
  0x43   : > { %p951_p2 = pneg %p950_p12 }
  0x45   : > { %p956_p4 = pnand %p954_p1, %p951_p2 }
  0x47   : > { %959 = shalt.err (!%p956_p4)
}
  0x48   : > { %s960_s27 = scalar_lea.vmem %s1177_s30, 2560  ;;  %p968_p3 = scmp.lt.s32.totalorder %s1177_s30, %s1177_s30 }
  0x49   : > { %p961_p6 = scmp.ne.s32.totalorder %s1177_s30, %s960_s27  ;;  %p969_p5 = scmp.lt.s32.totalorder %s960_s27, %s960_s27 }
  0x4b   : > { %p963_p8 = pnand %p961_p6, %p1187_p13  ;;  %p970_p7 = por %p969_p5, %p968_p3 }
  0x4d   : > { %p964_p0 = pneg %p963_p8 }
  0x4f   : > { %p971_p10 = pnand %p970_p7, %p964_p0 }
  0x51   : > { %974 = shalt.err (!%p971_p10)
}
  0x52   : > { %s1084_s5 = smov 256   ;;  %s1085_s10 = smov 16  }
  0x53   : > { %828 = dma.hbm_to_vmem [thread:$0]  (!%p1171_p11), %s1561_s3, 2560, %s1177_s30, [#allocation9], %s1084_s5, %s1084_s5, %s1085_s10  }
  0x54   : > { %s1250_s8 = sadd.s32 1, %s1079_s18   ;;  %s29_s9 = sadd.s32 1, %s1075_s17 }
  0x55   : > { %s26_s25 = ssub.s32 %s1079_s18, %s1250_s8  ;;  %p36_p9 = scmp.ne.s32.totalorder %s1075_s17, %s1071_s16 }
  0x56   : > { %p27_p13 = scmp.eq.s32.totalorder %s26_s25, 0  ;;  %p37_p12 = scmp.eq.s32.totalorder %s1079_s18, 0 }
  0x57   : > { %p840_p2 = scmp.lt.s32.totalorder %s1079_s18, 2  ;;  %p1571_p4 = scmp.eq.s32.totalorder %s1143_s19, 1 }
  0x58   : > { %s1260_s11 = scalar_select %p27_p13, %s1075_s17, %s29_s9  }
  0x59   : > { %p38_p1 = por %p37_p12, %p36_p9  ;;  %p1264_p6 = por %p1571_p4, %p36_p9 }
  0x5a   : > { %s190_s28 = sand.u32 1, %s1075_s17   ;;  %s761_s13 = sshll.u32 %s1079_s18, 8 }
  0x5b   : > { %s745_s30 = sshll.u32 %s190_s28, 4  ;;  %s1273_s24 = scalar_lea.hbm %s1558_s0, %s761_s13 }
  0x5c   : > { %s194_s26 = scalar_lea.vmem [#allocation2], %s745_s30  ;;  %p1275_p11 = pnand %p840_p2, %p38_p1 }
  0x5d   : > { %s202_s29 = sshll.u32 %s194_s26, 4  ;;  %s191_s5 = scalar_lea.sflag [#allocation3], %s190_s28  ;;  %s1279_s29 = int_to_ptr.vmem [resolvable:$true] %s202_s29 }
  0x5e   : > { %s975_s10 = scalar_lea.hbm %s1273_s24, 256  ;;  %p977_p0 = pneg %p1275_p11 }
  0x5f   : > { %p976_p8 = scmp.ne.s32.totalorder %s1273_s24, %s975_s10  ;;  %s980_s25 = scalar_lea.hbm %s1558_s0, 512 }
  0x60   : > { %p981_p7 = scmp.lt.u32.totalorder %s1273_s24, %s1558_s0  ;;  %p982_p10 = scmp.lt.u32.totalorder %s980_s25, %s975_s10 }
  0x61   : > { %p978_p3 = pnand %p977_p0, %p976_p8  ;;  %p984_p9 = scmp.lt.u32.totalorder %s975_s10, %s1273_s24 }
  0x62   : > { %p983_p13 = por %p982_p10, %p981_p7 }
  0x63   : > { %p979_p5 = pneg %p978_p3 }
  0x64   : > { %p985_p12 = por %p984_p9, %p983_p13 }
  0x66   : > { %p986_p2 = pnand %p985_p12, %p979_p5 }
  0x68   : > { %989 = shalt.err (!%p986_p2)
}
  0x69   : > { %s990_s28 = scalar_lea.vmem %s1279_s29, 256  ;;  %s1086_s30 = smov [#allocation2]  }
  0x6a   : > { %p991_p1 = scmp.ne.s32.totalorder %s1279_s29, %s990_s28  ;;  %s995_s14 = sshll.u32 %s1086_s30, 4  ;;  %s996_s14 = int_to_ptr.vmem [resolvable:$false] %s995_s14 }
  0x6b   : > { %s997_s20 = scalar_lea.vmem %s996_s14, 512  ;;  %p998_p3 = scmp.lt.s32.totalorder %s1279_s29, %s996_s14 }
  0x6c   : > { %p993_p4 = pnand %p991_p1, %p977_p0  ;;  %p999_p7 = scmp.lt.s32.totalorder %s997_s20, %s990_s28 }
  0x6e   : > { %p994_p8 = pneg %p993_p4  ;;  %p1000_p10 = por %p999_p7, %p998_p3 }
  0x70   : > { %p1001_p13 = pnand %p1000_p10, %p994_p8 }
  0x72   : > { %1004 = shalt.err (!%p1001_p13)
}
  0x73   : > { %832 = dma.hbm_to_vmem [thread:$0]  (!%p1275_p11), %s1273_s24, 256, %s1279_s29, %s191_s5  }
  0x74   : > { %p1574_p5 = scmp.ne.s32.totalorder %s1568_s23, 0 }
  0x75   : > { %s1309_s26 = sand.u32 (!%p1574_p5), 1, %s1071_s16   ;;  %p1575_p0 = scmp.ne.s32.totalorder (!%p1574_p5), %s1566_s21, 0 }
  0x76   : > { %211 = sbr.rel (%p1574_p5) target bundleno = 883 (0x373), region = 36  ;;  %s749_s10 = sshll.u32 (!%p1574_p5), %s1309_s26, 4 }
  0x77   : > { %s214_s6 = scalar_lea.sflag (!%p1574_p5), [#allocation3], %s1309_s26  ;;  %s217_s7 = scalar_lea.vmem (!%p1574_p5), [#allocation2], %s749_s10 }
  0x7d   : > { %1050 = dma.done.wait (%p1575_p0), %s214_s6, 256  }
  0x7e   : > { %1052 = vsyncadd (%p1575_p0), %s214_s6, 4294967040  ;;  %p1576_p11 = scmp.eq.s32.totalorder %s1143_s19, 0 }
  0x80   : > { %1054 = dma.done.wait (%p1576_p11), [#allocation6], 256   ;;  %p1577_p9 = pmov %p1576_p11 }
  0x82   : > { %1056 = vsyncadd (%p1577_p9), [#allocation6], 4294967040  ;;  %p1578_p12 = pmov %p1577_p9 }
  0x83   : > { %p1579_p2 = pmov %p1577_p9 }
  0x84   : > { %1058 = dma.done.wait (%p1578_p12), [#allocation9], 2560  }
  0x85   : > { %1060 = vsyncadd (%p1579_p2), [#allocation9], 4294964736  ;;  %v1327_v0 = vld [vmem:[%s217_s7 + $0x8] sm:$0xff]  ;;  %s1087_s23 = smov 16   ;;  %s1088_s21 = smov 17   ;;  %v1333_v1 = vld [vmem:[%s217_s7] sm:$0xff] }
  0x86   : > { %268 = vrot.lane.b32.xlu1 %v1327_v0, %s1087_s23  ;;  %257 = vrot.lane.b32.xlu0 %v1327_v0, %s1088_s21  ;;  %s1089_s24 = smov 15   ;;  %s1090_s29 = smov 1   ;;  %v1093_v2 = vmov 0.0   ;;  %vm273_vm0 = vcmask 130048   ;;  %v1363_v5 = vld [vmem:[#allocation8 + $0x10] sm:$0xff]  ;;  %vm263_vm1 = vcmask 138240  }
  0x87   : > { %s1091_s27 = smov 127   ;;  %s1092_s5 = smov 113   ;;  %445 = vmatprep.mubr.f32.mxu0 %v1093_v2  ;;  %614 = vmatprep.mubr.f32.mxu1 %v1093_v2  ;;  %v1365_v6 = vld [vmem:[#allocation8] sm:$0xff]  ;;  %v1367_v7 = vld [vmem:[#allocation8 + $0x8] sm:$0xff]  ;;  %v1369_v8 = vld [vmem:[#allocation8 + $0x18] sm:$0xff]  ;;  %vm283_vm2 = vcmask 121856  }
  0x88   : > { %s1094_s25 = smov 112   ;;  %s1095_s9 = smov 111   ;;  %v1379_v23 = vld [vmem:[#allocation8 + $0x20] sm:$0xff]  ;;  %vm293_vm3 = vcmask 7168   ;;  %v1381_v24 = vld [vmem:[#allocation8 + $0x28] sm:$0xff]  ;;  %v1385_v27 = vld [vmem:[#allocation8 + $0x30] sm:$0xff] }
  0x89   : > { %v1387_v28 = vld [vmem:[#allocation8 + $0x38] sm:$0xff]  ;;  %vm302_vm4 = vcmask 1039360   ;;  %v1391_v33 = vld [vmem:[#allocation8 + $0x48] sm:$0xff]  ;;  %v1393_v34 = vld [vmem:[#allocation8 + $0x40] sm:$0xff]  ;;  %vm312_vm5 = vcmask 924672   ;;  %vm322_vm6 = vcmask 916480  }
  0x8a   : > { %271 = vrot.lane.b32.xlu1 %v1333_v1, %s1087_s23  ;;  %261 = vrot.lane.b32.xlu0 %v1333_v1, %s1088_s21  ;;  %v1399_v39 = vld [vmem:[#allocation8 + $0x50] sm:$0xff]  ;;  %v1401_v40 = vld [vmem:[#allocation8 + $0x58] sm:$0xff]  ;;  %v367_v45 = vmul.f32 %v1391_v33, %v1327_v0  ;;  %v366_v46 = vmul.f32 %v1393_v34, %v1333_v1  ;;  %v1411_v55 = vld [vmem:[#allocation8 + $0x60] sm:$0xff]  ;;  %vm332_vm7 = vcmask 908288   ;;  %vm377_vm8 = vcmask 654336   ;;  %s762_s13 = sshll.u32 %s1143_s19, 8 }
  0x8b   : > { %v1413_v56 = vld [vmem:[#allocation8 + $0x68] sm:$0xff]  ;;  %v1417_v59 = vld [vmem:[#allocation8 + $0x70] sm:$0xff]  ;;  %v1419_v60 = vld [vmem:[#allocation8 + $0x78] sm:$0xff]  ;;  %s253_s28 = scalar_lea.vmem [#allocation10], %s749_s10  ;;  %s1514_s6 = scalar_lea.hbm %s1562_s4, %s762_s13 }
  0x8c   : > { %s640_s30 = sshll.u32 %s253_s28, 4  ;;  %s626_s19 = scalar_lea.sflag [#allocation4], %s1309_s26  ;;  %s1516_s30 = int_to_ptr.vmem [resolvable:$true] %s640_s30 }
  0x8d   : > { %s1005_s7 = scalar_lea.vmem %s1516_s30, 256  ;;  %s1096_s10 = smov [#allocation10]  }
  0x8e   : > { %281 = vrot.lane.b32.xlu1 %v1333_v1, %s1089_s24  ;;  %278 = vrot.lane.b32.xlu0 %v1327_v0, %s1089_s24  ;;  %p1006_p1 = scmp.ne.s32.totalorder %s1516_s30, %s1005_s7 }
  0x90   : > { %p1007_p4 = pnand %p1006_p1, %p1264_p6 }
  0x92   : > { %291 = vrot.lane.b32.xlu1 %v1333_v1, %s1090_s29  ;;  %288 = vrot.lane.b32.xlu0 %v1327_v0, %s1090_s29  ;;  %p1008_p8 = pneg %p1007_p4 }
  0x96   : > { %300 = vrot.lane.b32.xlu1 %v1327_v0, %s1091_s27  ;;  %298 = vrot.lane.b32.xlu0 %v1333_v1, %s1091_s27 }
  0x9a   : > { %310 = vrot.lane.b32.xlu1 %v1327_v0, %s1092_s5  ;;  %308 = vrot.lane.b32.xlu0 %v1333_v1, %s1092_s5 }
  0x9e   : > { %320 = vrot.lane.b32.xlu1 %v1327_v0, %s1094_s25  ;;  %318 = vrot.lane.b32.xlu0 %v1333_v1, %s1094_s25 }
  0xa2   : > { %330 = vrot.lane.b32.xlu1 %v1327_v0, %s1095_s9  ;;  %328 = vrot.lane.b32.xlu0 %v1333_v1, %s1095_s9 }
  0xf8   : > { %v269_v3 = vpop.permute.xlu1 %268  ;;  %v258_v4 = vpop.permute.xlu0 %257 }
  0xfc   : > { %v272_v9 = vpop.permute.xlu1 %271  ;;  %v262_v10 = vpop.permute.xlu0 %261 }
  0xfd   : > { %v274_v11 = vsel %vm273_vm0, %v272_v9, %v269_v3  ;;  %v277_v12 = vsel %vm273_vm0, %v269_v3, %v272_v9  ;;  %v264_v13 = vsel %vm263_vm1, %v262_v10, %v258_v4  ;;  %v267_v14 = vsel %vm263_vm1, %v258_v4, %v262_v10 }
  0xfe   : > { %v360_v15 = vmul.f32 %v1363_v5, %v277_v12  ;;  %v358_v16 = vmul.f32 %v1365_v6, %v267_v14  ;;  %v359_v17 = vmul.f32 %v1367_v7, %v264_v13  ;;  %v361_v18 = vmul.f32 %v1369_v8, %v274_v11  ;;  %v1427_v11 = vld [vmem:[#allocation8 + $0x80] sm:$0xff]  ;;  %v1429_v12 = vld [vmem:[#allocation8 + $0x88] sm:$0xff] }
 0x100   : > { %v282_v19 = vpop.permute.xlu1 %281  ;;  %v279_v20 = vpop.permute.xlu0 %278  ;;  %v763_v21 = vpack.c.bf16 %v361_v18, %v359_v17  ;;  %v765_v22 = vpack.c.bf16 %v360_v15, %v358_v16 }
 0x101   : > { %v284_v25 = vsel %vm283_vm2, %v282_v19, %v279_v20  ;;  %v287_v26 = vsel %vm283_vm2, %v279_v20, %v282_v19  ;;  %v1433_v19 = vld [vmem:[#allocation8 + $0x98] sm:$0xff]  ;;  %v1435_v20 = vld [vmem:[#allocation8 + $0x90] sm:$0xff] }
 0x102   : > { %764 = vmatprep.subr.bf16.mxu0 %v763_v21  ;;  %v362_v35 = vmul.f32 %v1379_v23, %v287_v26  ;;  %v363_v36 = vmul.f32 %v1381_v24, %v284_v25 }
 0x103   : > { %766 = vmatpush1.bf16.msra.mxu0 %v765_v22 }
 0x104   : > { %v292_v29 = vpop.permute.xlu1 %291  ;;  %v289_v30 = vpop.permute.xlu0 %288 }
 0x105   : > { %v294_v31 = vsel %vm293_vm3, %v292_v29, %v289_v30  ;;  %v297_v32 = vsel %vm293_vm3, %v289_v30, %v292_v29  ;;  %v376_v29 = vld [vmem:[#allocation5] sm:$0xff] }
 0x106   : > { %v364_v37 = vmul.f32 %v1385_v27, %v297_v32  ;;  %v365_v38 = vmul.f32 %v1387_v28, %v294_v31 }
 0x108   : > { %v301_v41 = vpop.permute.xlu1 %300  ;;  %v299_v42 = vpop.permute.xlu0 %298  ;;  %v767_v43 = vpack.c.bf16 %v365_v38, %v363_v36  ;;  %v769_v44 = vpack.c.bf16 %v364_v37, %v362_v35 }
 0x109   : > { %v303_v47 = vsel %vm302_vm4, %v299_v42, %v301_v41  ;;  %v307_v48 = vsel %vm302_vm4, %v301_v41, %v299_v42 }
 0x10a   : > { %v368_v49 = vmul.f32 %v1399_v39, %v303_v47  ;;  %v369_v50 = vmul.f32 %v1401_v40, %v307_v48  ;;  %768 = vmatprep.subr.bf16.mxu0 %v767_v43 }
 0x10b   : > { %770 = vmatpush1.bf16.msra.mxu0 %v769_v44 }
 0x10c   : > { %v311_v51 = vpop.permute.xlu1 %310  ;;  %v309_v52 = vpop.permute.xlu0 %308  ;;  %v771_v53 = vpack.c.bf16 %v369_v50, %v367_v45  ;;  %v773_v54 = vpack.c.bf16 %v368_v49, %v366_v46 }
 0x10d   : > { %v313_v57 = vsel %vm312_vm5, %v309_v52, %v311_v51  ;;  %v317_v58 = vsel %vm312_vm5, %v311_v51, %v309_v52 }
 0x10e   : > { %772 = vmatprep.subr.bf16.mxu0 %v771_v53  ;;  %v370_v3 = vmul.f32 %v1411_v55, %v313_v57  ;;  %v371_v4 = vmul.f32 %v1413_v56, %v317_v58 }
 0x10f   : > { %774 = vmatpush1.bf16.msra.mxu0 %v773_v54 }
 0x110   : > { %v321_v61 = vpop.permute.xlu1 %320  ;;  %v319_v62 = vpop.permute.xlu0 %318 }
 0x111   : > { %v323_v63 = vsel %vm322_vm6, %v319_v62, %v321_v61  ;;  %v327_v2 = vsel %vm322_vm6, %v321_v61, %v319_v62 }
 0x112   : > { %v372_v9 = vmul.f32 %v1417_v59, %v323_v63  ;;  %v373_v10 = vmul.f32 %v1419_v60, %v327_v2 }
 0x114   : > { %v331_v13 = vpop.permute.xlu1 %330  ;;  %v329_v14 = vpop.permute.xlu0 %328  ;;  %v775_v15 = vpack.c.bf16 %v373_v10, %v371_v4  ;;  %v777_v16 = vpack.c.bf16 %v372_v9, %v370_v3 }
 0x115   : > { %v333_v17 = vsel %vm332_vm7, %v329_v14, %v331_v13  ;;  %v337_v18 = vsel %vm332_vm7, %v331_v13, %v329_v14 }
 0x116   : > { %v374_v21 = vmul.f32 %v1427_v11, %v333_v17  ;;  %v375_v22 = vmul.f32 %v1429_v12, %v337_v18  ;;  %776 = vmatprep.subr.bf16.mxu0 %v775_v15 }
 0x117   : > { %778 = vmatpush1.bf16.msra.mxu0 %v777_v16 }
 0x118   : > { %v779_v25 = vpack.c.bf16 %v1433_v19, %v375_v22  ;;  %v781_v26 = vpack.c.bf16 %v1435_v20, %v374_v21 }
 0x11a   : > { %780 = vmatprep.subr.bf16.mxu0 %v779_v25 }
 0x11b   : > { %782 = vmatpush1.bf16.msra.mxu0 %v781_v26 }
 0x11e   : > { %754 = vmatmul.mubr.msk.f32.vlgmr.msra.gmra.mrb[0].mxu0 %vm377_vm8, %v376_v29 }
 0x1f1   : > { %v447_v30 = vpop.f32.mrb[0].mxu0 }
 0x1f2   : > { %v1442_v31 = vmax.f32 %v447_v30, 0.0  ;;  %v449_v32 = vpop.f32.mrb[1].mxu0 }
 0x1f3   : > { %v453_v35 = vmax.f32 %v449_v32, 0.0 }
 0x1f4   : > { %492 = vrot.lane.b32.xlu0 %v1442_v31, %s1091_s27  ;;  %459 = vrot.lane.b32.xlu1 %v1442_v31, %s1088_s21 }
 0x1f8   : > { %468 = vrot.lane.b32.xlu1 %v1442_v31, %s1087_s23  ;;  %455 = vrot.lane.b32.xlu0 %v453_v35, %s1088_s21 }
 0x1fc   : > { %477 = vrot.lane.b32.xlu1 %v1442_v31, %s1089_s24  ;;  %465 = vrot.lane.b32.xlu0 %v453_v35, %s1087_s23  ;;  %s1009_s23 = sshll.u32 %s1096_s10, 4  ;;  %s1010_s23 = int_to_ptr.vmem [resolvable:$false] %s1009_s23 }
 0x1fd   : > { %s1011_s21 = scalar_lea.vmem %s1010_s23, 512  ;;  %p1012_p3 = scmp.lt.s32.totalorder %s1516_s30, %s1010_s23 }
 0x1fe   : > { %p1013_p7 = scmp.lt.s32.totalorder %s1011_s21, %s1005_s7 }
 0x200   : > { %486 = vrot.lane.b32.xlu1 %v1442_v31, %s1090_s29  ;;  %474 = vrot.lane.b32.xlu0 %v453_v35, %s1089_s24  ;;  %p1014_p10 = por %p1013_p7, %p1012_p3 }
 0x202   : > { %p1015_p13 = pnand %p1014_p10, %p1008_p8 }
 0x204   : > { %494 = vrot.lane.b32.xlu1 %v453_v35, %s1091_s27  ;;  %483 = vrot.lane.b32.xlu0 %v453_v35, %s1090_s29 }
 0x208   : > { %503 = vrot.lane.b32.xlu1 %v453_v35, %s1092_s5  ;;  %501 = vrot.lane.b32.xlu0 %v1442_v31, %s1092_s5 }
 0x20c   : > { %512 = vrot.lane.b32.xlu1 %v453_v35, %s1094_s25  ;;  %510 = vrot.lane.b32.xlu0 %v1442_v31, %s1094_s25 }
 0x210   : > { %521 = vrot.lane.b32.xlu1 %v453_v35, %s1095_s9  ;;  %519 = vrot.lane.b32.xlu0 %v1442_v31, %s1095_s9 }
 0x266   : > { %v493_v36 = vpop.permute.xlu0 %492  ;;  %v460_v37 = vpop.permute.xlu1 %459 }
 0x26a   : > { %v469_v38 = vpop.permute.xlu1 %468  ;;  %v456_v41 = vpop.permute.xlu0 %455 }
 0x26b   : > { %v461_v42 = vsel %vm263_vm1, %v460_v37, %v456_v41  ;;  %v464_v43 = vsel %vm263_vm1, %v456_v41, %v460_v37 }
 0x26c   : > { %v528_v48 = vmul.f32 %v464_v43, %v1365_v6  ;;  %v529_v50 = vmul.f32 %v461_v42, %v1367_v7 }
 0x26e   : > { %v478_v44 = vpop.permute.xlu1 %477  ;;  %v466_v45 = vpop.permute.xlu0 %465 }
 0x26f   : > { %v470_v46 = vsel %vm273_vm0, %v469_v38, %v466_v45  ;;  %v473_v47 = vsel %vm273_vm0, %v466_v45, %v469_v38 }
 0x270   : > { %v530_v49 = vmul.f32 %v473_v47, %v1363_v5  ;;  %v531_v51 = vmul.f32 %v470_v46, %v1369_v8 }
 0x272   : > { %v487_v52 = vpop.permute.xlu1 %486  ;;  %v475_v53 = vpop.permute.xlu0 %474  ;;  %v783_v54 = vpack.c.bf16 %v531_v51, %v529_v50  ;;  %v785_v57 = vpack.c.bf16 %v530_v49, %v528_v48 }
 0x273   : > { %v482_v58 = vsel %vm283_vm2, %v475_v53, %v478_v44  ;;  %v479_v61 = vsel %vm283_vm2, %v478_v44, %v475_v53 }
 0x274   : > { %784 = vmatprep.subr.bf16.mxu1 %v783_v54  ;;  %v532_v62 = vmul.f32 %v482_v58, %v1379_v23  ;;  %v533_v5 = vmul.f32 %v479_v61, %v1381_v24  ;;  %v537_v24 = vmul.f32 %v453_v35, %v1391_v33 }
 0x275   : > { %786 = vmatpush1.bf16.msra.mxu1 %v785_v57 }
 0x276   : > { %v495_v63 = vpop.permute.xlu1 %494  ;;  %v484_v6 = vpop.permute.xlu0 %483 }
 0x277   : > { %v500_v7 = vsel %vm302_vm4, %v495_v63, %v493_v36  ;;  %v488_v8 = vsel %vm293_vm3, %v487_v52, %v484_v6  ;;  %v491_v2 = vsel %vm293_vm3, %v484_v6, %v487_v52  ;;  %v496_v3 = vsel %vm302_vm4, %v493_v36, %v495_v63 }
 0x278   : > { %v539_v4 = vmul.f32 %v500_v7, %v1401_v40  ;;  %v534_v9 = vmul.f32 %v491_v2, %v1385_v27  ;;  %v535_v10 = vmul.f32 %v488_v8, %v1387_v28  ;;  %v538_v16 = vmul.f32 %v496_v3, %v1399_v39 }
 0x279   : > { %v536_v27 = vmul.f32 %v1442_v31, %v1393_v34 }
 0x27a   : > { %v504_v13 = vpop.permute.xlu1 %503  ;;  %v502_v23 = vpop.permute.xlu0 %501  ;;  %v787_v14 = vpack.c.bf16 %v535_v10, %v533_v5  ;;  %v789_v15 = vpack.c.bf16 %v534_v9, %v532_v62  ;;  %v791_v17 = vpack.c.bf16 %v539_v4, %v537_v24 }
 0x27b   : > { %v505_v18 = vsel %vm312_vm5, %v502_v23, %v504_v13  ;;  %v509_v21 = vsel %vm312_vm5, %v504_v13, %v502_v23  ;;  %v793_v33 = vpack.c.bf16 %v538_v16, %v536_v27 }
 0x27c   : > { %788 = vmatprep.subr.bf16.mxu1 %v787_v14  ;;  %v540_v39 = vmul.f32 %v505_v18, %v1411_v55  ;;  %v541_v26 = vmul.f32 %v509_v21, %v1413_v56 }
 0x27d   : > { %790 = vmatpush1.bf16.msra.mxu1 %v789_v15 }
 0x27e   : > { %v513_v40 = vpop.permute.xlu1 %512  ;;  %v511_v28 = vpop.permute.xlu0 %510  ;;  %792 = vmatprep.subr.bf16.mxu1 %v791_v17 }
 0x27f   : > { %v514_v22 = vsel %vm322_vm6, %v511_v28, %v513_v40  ;;  %v518_v25 = vsel %vm322_vm6, %v513_v40, %v511_v28 }
 0x280   : > { %v542_v29 = vmul.f32 %v514_v22, %v1417_v59  ;;  %v543_v30 = vmul.f32 %v518_v25, %v1419_v60  ;;  %v546_v60 = vld [vmem:[#allocation7] sm:$0xff] }
 0x281   : > { %794 = vmatpush1.bf16.msra.mxu1 %v793_v33 }
 0x282   : > { %v522_v32 = vpop.permute.xlu1 %521  ;;  %v520_v35 = vpop.permute.xlu0 %519  ;;  %v795_v34 = vpack.c.bf16 %v543_v30, %v541_v26  ;;  %v797_v31 = vpack.c.bf16 %v542_v29, %v540_v39 }
 0x283   : > { %v523_v36 = vsel %vm332_vm7, %v520_v35, %v522_v32  ;;  %v527_v37 = vsel %vm332_vm7, %v522_v32, %v520_v35 }
 0x284   : > { %v544_v38 = vmul.f32 %v523_v36, %v1427_v11  ;;  %v545_v55 = vmul.f32 %v527_v37, %v1429_v12  ;;  %796 = vmatprep.subr.bf16.mxu1 %v795_v34 }
 0x285   : > { %798 = vmatpush1.bf16.msra.mxu1 %v797_v31 }
 0x286   : > { %v799_v56 = vpack.c.bf16 %v1433_v19, %v545_v55  ;;  %v801_v59 = vpack.c.bf16 %v1435_v20, %v544_v38 }
 0x288   : > { %800 = vmatprep.subr.bf16.mxu1 %v799_v56 }
 0x289   : > { %802 = vmatpush1.bf16.msra.mxu1 %v801_v59 }
 0x28c   : > { %755 = vmatmul.mubr.msk.f32.vlgmr.msra.gmra.mrb[0].mxu1 %vm377_vm8, %v546_v60 }
 0x35f   : > { %v616_v41 = vpop.f32.mrb[0].mxu1 }
 0x360   : > { %v617_v42 = vadd.f32 %v616_v41, %v1333_v1  ;;  %v618_v43 = vpop.f32.mrb[1].mxu1 }
 0x361   : > { %v619_v11 = vadd.f32 %v618_v43, %v1327_v0 }
 0x362   : > { %v621_v12 = vmax.f32 %v617_v42, 0.0 }
 0x363   : > { %v622_v19 = vmax.f32 %v619_v11, 0.0 }
 0x364   : > { %623 = vst [vmem:[%s253_s28] sm:$0xff] %v621_v12 }
 0x365   : > { %624 = vst [vmem:[%s253_s28 + $0x8] sm:$0xff] %v622_v19 }
 0x366   : > { %1018 = shalt.err (!%p1015_p13)
}
 0x367   : > { %s1019_s26 = scalar_lea.hbm %s1514_s6, 256  ;;  %s1023_s27 = scalar_lea.hbm %s1562_s4, 512 }
 0x368   : > { %p1020_p5 = scmp.ne.s32.totalorder %s1514_s6, %s1019_s26  ;;  %p1024_p9 = scmp.lt.u32.totalorder %s1514_s6, %s1562_s4 }
 0x369   : > { %p1025_p12 = scmp.lt.u32.totalorder %s1023_s27, %s1019_s26  ;;  %p1027_p1 = scmp.lt.u32.totalorder %s1019_s26, %s1514_s6 }
 0x36a   : > { %p1021_p0 = pnand %p1020_p5, %p1264_p6 }
 0x36b   : > { %p1026_p2 = por %p1025_p12, %p1024_p9 }
 0x36c   : > { %p1022_p11 = pneg %p1021_p0 }
 0x36d   : > { %p1028_p4 = por %p1027_p1, %p1026_p2 }
 0x36f   : > { %p1029_p8 = pnand %p1028_p4, %p1022_p11 }
 0x371   : > { %1032 = shalt.err (!%p1029_p8)
}
 0x372   : > { %817 = dma.vmem_to_hbm [thread:$0]  (%p1264_p6), %s1516_s30, 256, %s1514_s6, %s626_s19  }
 0x373 PF: > { %s652_s9 = sand.u32 1, %s1067_s15   ;;  %p1580_p3 = scmp.ne.s32.totalorder %s1567_s22, 0 }
 0x374   : > { %p1581_p7 = scmp.ge.s32.totalorder %s1079_s18, 2  ;;  %s653_s13 = scalar_lea.sflag [#allocation4], %s652_s9 }
 0x376   : > { %p834_p10 = pnand %p1581_p7, %p1580_p3 }
 0x378   : > { %1062 = dma.done.wait (!%p834_p10), %s653_s13, 256  }
 0x379   : > { %1064 = vsyncadd (!%p834_p10), %s653_s13, 4294967040  ;;  %p19_p13 = scmp.ge.s32.totalorder %s1250_s8, 4   ;;  %s1582_s15 = smov %s1071_s16 }
 0x37a   : > { %s1583_s16 = smov %s1075_s17  ;;  %s1584_s17 = smov %s1260_s11 }
 0x37b   : > { %s1585_s18 = smov %s1250_s8  ;;  %21 = sbr.rel (!%p19_p13) target bundleno = 7 (0x7), region = 93 }
 0x382   :  { %658 = vsyncpa [#allocation3], 1 }
 0x383   :  { %660 = vsyncpa [#allocation3 + $0x1], 1 }
 0x384   :  { %661 = vsyncpa [#allocation6], 1 }
 0x385   :  { %662 = vsyncpa [#allocation9], 1 }
 0x386   :  { %663 = vsyncpa [#allocation4], 1 }
 0x387   :  { %665 = vsyncpa [#allocation4 + $0x1], 1 }

</bundles_post_ra>
